<compile_context>
chip_gen: v7x
topology: tpu7x:2x2x1
jax: 0.10.0
libtpu: 0.0.40
codegen_flags: <defaults>
</compile_context>

<pallas_src>
import functools

import jax
import jax.numpy as jnp
from jax import lax
from jax.experimental import pallas as pl
from jax.experimental.pallas import tpu as pltpu


def _round_up(v, m):
    return (v + m - 1) // m * m


# --------------------------------------------------------------------------
# Kernels (each handles both the collapsed-K 2-D grid and the K-tiled 3-D grid)
# --------------------------------------------------------------------------

def _store_or_accumulate(o_ref, partial, b_ref, k_grid):
    if k_grid:
        k = pl.program_id(2)

        @pl.when(k == 0)
        def _():
            o_ref[...] = jnp.zeros_like(o_ref)

        # Output block index is constant across k, so o_ref stays VMEM-resident
        # for the whole K sweep — accumulate directly, no scratch needed.
        o_ref[...] += partial

        @pl.when(k == pl.num_programs(2) - 1)
        def _():
            o_ref[...] += b_ref[...]
    else:
        o_ref[...] = partial + b_ref[...]


def _eval_kernel(x_ref, wmu_ref, b_ref, o_ref, *, compute_dtype, k_grid):
    partial = lax.dot_general(
        x_ref[...].astype(compute_dtype), wmu_ref[...].astype(compute_dtype),
        dimension_numbers=(((1,), (1,)), ((), ())),
        preferred_element_type=jnp.float32)
    _store_or_accumulate(o_ref, partial, b_ref, k_grid)


def _train_fused_kernel(x_ref, wmu_ref, wsig_eps_ref, eps_in_ref, b_ref, o_ref,
                        *, compute_dtype, k_grid):
    # W_sigma was pre-scaled by eps_out at prepare time, so the only in-kernel
    # noise work is a cheap (1, tk) sublane-broadcast multiply, done in f32
    # (v5e has no bf16 VALU).
    w = (wmu_ref[...].astype(jnp.float32)
         + wsig_eps_ref[...].astype(jnp.float32)
         * eps_in_ref[...].astype(jnp.float32))
    partial = lax.dot_general(
        x_ref[...].astype(compute_dtype), w.astype(compute_dtype),
        dimension_numbers=(((1,), (1,)), ((), ())),
        preferred_element_type=jnp.float32)
    _store_or_accumulate(o_ref, partial, b_ref, k_grid)


def _train_reassoc_kernel(x_ref, xeps_ref, wmu_ref, wsig_eps_ref, b_ref, o_ref,
                          *, compute_dtype, k_grid):
    # y = x @ W_mu^T + (x*eps_in) @ (W_sigma*eps_out)^T + b
    # Two MXU dots, zero per-element weight combine — better when tm is small
    # and the VPU (not the MXU) would otherwise be the saturated slot.
    mu_part = lax.dot_general(
        x_ref[...].astype(compute_dtype), wmu_ref[...].astype(compute_dtype),
        dimension_numbers=(((1,), (1,)), ((), ())),
        preferred_element_type=jnp.float32)
    sig_part = lax.dot_general(
        xeps_ref[...].astype(compute_dtype), wsig_eps_ref[...].astype(compute_dtype),
        dimension_numbers=(((1,), (1,)), ((), ())),
        preferred_element_type=jnp.float32)
    _store_or_accumulate(o_ref, mu_part + sig_part, b_ref, k_grid)


# --------------------------------------------------------------------------
# One-time preparation (per init / reset_noise) — keeps weight-sized padding,
# eps_out folding and the bias combine out of the per-forward hot path.
# --------------------------------------------------------------------------

def prepare_noisy_linear(params, *, tn_max=256, weights_dtype=jnp.float32):
    wmu = params["weight_mu"]
    wsig = params["weight_sigma"]
    eps_in = params["eps_in"]
    eps_out = params["eps_out"]
    bmu = params["bias_mu"]
    bsig = params["bias_sigma"]
    beps = params["bias_epsilon"]

    N, K = wmu.shape
    Np = _round_up(N, 128)
    Kp = _round_up(K, 128)
    tn = min(tn_max, Np)

    def pad2(a, rows, cols):
        return jnp.pad(a, ((0, rows - a.shape[0]), (0, cols - a.shape[1])))

    # Fold eps_out into W_sigma (one weight-sized pass per noise reset) so no
    # kernel needs the (tn, 1) lane broadcast in its inner loop.
    wsig_eps = wsig * eps_out[:, None]

    return dict(
        N=N, K=K, Np=Np, Kp=Kp, tn=tn,
        wmu=pad2(wmu, Np, Kp).astype(weights_dtype),
        wsig_eps=pad2(wsig_eps, Np, Kp).astype(weights_dtype),
        eps_in=pad2(eps_in.reshape(1, K).astype(jnp.float32), 1, Kp),
        b_train=pad2((bmu + bsig * beps).reshape(1, N).astype(jnp.float32), 1, Np),
        b_eval=pad2(bmu.reshape(1, N).astype(jnp.float32), 1, Np),
    )


# --------------------------------------------------------------------------
# Forward wrapper
# --------------------------------------------------------------------------

_VMEM_LIMIT_BYTES = 48 * 1024 * 1024   # above default scoped VMEM on v5e (16 MiB) / v6e,v7x (32 MiB)
_TILE_VMEM_BUDGET = 26 * 1024 * 1024   # double-buffered per-step working-set target (safe on v7x's 64 MiB)


def _choose_tk(Kp, tm, tn, n_x_streams, n_w_streams, w_bytes):
    """Largest lane-aligned divisor of Kp whose double-buffered working set fits."""
    def fits(tk):
        per_step = (n_x_streams * tm * tk * 4
                    + n_w_streams * tn * tk * w_bytes
                    + tk * 4 + tn * 4)
        return 2 * per_step + 2 * tm * tn * 4 <= _TILE_VMEM_BUDGET

    if fits(Kp):
        return Kp
    best = 128
    n_lanes = Kp // 128
    for d in range(1, n_lanes + 1):
        if n_lanes % d == 0:
            tk = 128 * d
            if tk < Kp and fits(tk):
                best = max(best, tk)
    return best


def noisy_linear_forward(x, prepared, *, training=True, tm_max=256,
                         small_batch_threshold=64, compute_dtype=jnp.float32):
    """Pallas forward of NoisyLinear. x: [B, K] f32 -> [B, N] f32."""
    B, K = x.shape
    assert K == prepared["K"], "input feature dim mismatch"
    N, Np, Kp, tn = prepared["N"], prepared["Np"], prepared["Kp"], prepared["tn"]

    tm = min(tm_max, _round_up(B, 8))
    Bp = _round_up(B, tm)

    # Only the (small) activation is padded per call.
    x_p = jnp.pad(x, ((0, Bp - B), (0, Kp - K)))

    use_reassoc = training and (tm <= small_batch_threshold)
    w_bytes = jnp.dtype(prepared["wmu"].dtype).itemsize
    n_w = 2 if training else 1
    n_x = 2 if use_reassoc else 1
    tk = _choose_tk(Kp, tm, tn, n_x, n_w, w_bytes)
    k_grid = tk != Kp

    if k_grid:
        x_spec = pl.BlockSpec((tm, tk), lambda i, j, k: (i, k))
        w_spec = pl.BlockSpec((tn, tk), lambda i, j, k: (j, k))
        row_k_spec = pl.BlockSpec((1, tk), lambda i, j, k: (0, k))
        row_n_spec = pl.BlockSpec((1, tn), lambda i, j, k: (0, j))
        out_spec = pl.BlockSpec((tm, tn), lambda i, j, k: (i, j))
        grid = (Bp // tm, Np // tn, Kp // tk)
        semantics = ("parallel", "parallel", "arbitrary")
    else:
        x_spec = pl.BlockSpec((tm, tk), lambda i, j: (i, 0))
        w_spec = pl.BlockSpec((tn, tk), lambda i, j: (j, 0))
        row_k_spec = pl.BlockSpec((1, tk), lambda i, j: (0, 0))
        row_n_spec = pl.BlockSpec((1, tn), lambda i, j: (0, j))
        out_spec = pl.BlockSpec((tm, tn), lambda i, j: (i, j))
        grid = (Bp // tm, Np // tn)
        semantics = ("parallel", "parallel")

    if not training:
        kernel = functools.partial(_eval_kernel,
                                   compute_dtype=compute_dtype, k_grid=k_grid)
        in_specs = [x_spec, w_spec, row_n_spec]
        args = (x_p, prepared["wmu"], prepared["b_eval"])
    elif use_reassoc:
        x_eps = x_p * prepared["eps_in"]     # fold eps_in into the activation (tiny at small B)
        kernel = functools.partial(_train_reassoc_kernel,
                                   compute_dtype=compute_dtype, k_grid=k_grid)
        in_specs = [x_spec, x_spec, w_spec, w_spec, row_n_spec]
        args = (x_p, x_eps, prepared["wmu"], prepared["wsig_eps"],
                prepared["b_train"])
    else:
        kernel = functools.partial(_train_fused_kernel,
                                   compute_dtype=compute_dtype, k_grid=k_grid)
        in_specs = [x_spec, w_spec, w_spec, row_k_spec, row_n_spec]
        args = (x_p, prepared["wmu"], prepared["wsig_eps"], prepared["eps_in"],
                prepared["b_train"])

    y_p = pl.pallas_call(
        kernel,
        out_shape=jax.ShapeDtypeStruct((Bp, Np), jnp.float32),
        grid_spec=pltpu.PrefetchScalarGridSpec(
            num_scalar_prefetch=0,
            grid=grid,
            in_specs=in_specs,
            out_specs=out_spec),
        compiler_params=pltpu.CompilerParams(
            dimension_semantics=semantics,
            vmem_limit_bytes=_VMEM_LIMIT_BYTES),
    )(*args)

    return y_p[:B, :N]


# --------------------------------------------------------------------------
# Parameter / noise init (mirrors reset_parameter() + reset_noise())
# --------------------------------------------------------------------------

def _scale_noise(key, size):
    n = jax.random.normal(key, (size,), dtype=jnp.float32)
    return jnp.sign(n) * jnp.sqrt(jnp.abs(n))


def init_noisy_linear_params(key, input_dim, output_dim, std_init=0.4):
    k_wmu, k_bmu, k_ein, k_eout, k_beps = jax.random.split(key, 5)
    mu_range = 1.0 / jnp.sqrt(jnp.float32(input_dim))

    weight_mu = jax.random.uniform(k_wmu, (output_dim, input_dim),
                                   minval=-mu_range, maxval=mu_range,
                                   dtype=jnp.float32)
    bias_mu = jax.random.uniform(k_bmu, (output_dim,),
                                 minval=-mu_range, maxval=mu_range,
                                 dtype=jnp.float32)
    weight_sigma = jnp.full((output_dim, input_dim),
                            std_init / jnp.sqrt(jnp.float32(input_dim)),
                            dtype=jnp.float32)
    bias_sigma = jnp.full((output_dim,),
                          std_init / jnp.sqrt(jnp.float32(output_dim)),
                          dtype=jnp.float32)

    eps_in = _scale_noise(k_ein, input_dim)
    eps_out = _scale_noise(k_eout, output_dim)
    bias_epsilon = _scale_noise(k_beps, output_dim)   # fresh draw, as in reset_noise()

    return dict(weight_mu=weight_mu, weight_sigma=weight_sigma,
                eps_in=eps_in, eps_out=eps_out,
                bias_mu=bias_mu, bias_sigma=bias_sigma,
                bias_epsilon=bias_epsilon)


if __name__ == "__main__":
    key = jax.random.PRNGKey(0)
    k_params, k_x = jax.random.split(key)

    batch, input_dim, output_dim = 8, 32, 16
    params = init_noisy_linear_params(k_params, input_dim, output_dim,
                                      std_init=0.4)
    x = jax.random.normal(k_x, (batch, input_dim), dtype=jnp.float32)

    # One-time (per reset_noise) preparation — not in the per-forward hot path.
    prepared = prepare_noisy_linear(params)

    # Training forward, small-batch reassociated path (auto-selected at B=8).
    y_train = noisy_linear_forward(x, prepared, training=True)
    # Training forward, fused-combine path (forced, to exercise the large-batch kernel).
    y_train_fused = noisy_linear_forward(x, prepared, training=True,
                                         small_batch_threshold=0)
    # Eval forward (mu only).
    y_eval = noisy_linear_forward(x, prepared, training=False)
    jax.block_until_ready((y_train, y_train_fused, y_eval))

    # Plain-JAX reference (weight_epsilon materialized only here).
    weight_epsilon = jnp.outer(params["eps_out"], params["eps_in"])
    w_ref = params["weight_mu"] + params["weight_sigma"] * weight_epsilon
    b_ref = params["bias_mu"] + params["bias_sigma"] * params["bias_epsilon"]
    ref_train = x @ w_ref.T + b_ref
    ref_eval = x @ params["weight_mu"].T + params["bias_mu"]

    assert jnp.allclose(y_train, ref_train, atol=1e-5, rtol=1e-5)
    assert jnp.allclose(y_train_fused, ref_train, atol=1e-5, rtol=1e-5)
    assert jnp.allclose(y_eval, ref_eval, atol=1e-5, rtol=1e-5)

    print("KERNEL_OK")
</pallas_src>

<mosaic_0001>
module attributes {stable_mosaic.version = 11 : i64} {
  func.func @_train_reassoc_kernel(%arg0: i32, %arg1: i32, %arg2: memref<8x128xf32, #tpu.memory_space<vmem>>, %arg3: memref<8x128xf32, #tpu.memory_space<vmem>>, %arg4: memref<128x128xf32, #tpu.memory_space<vmem>>, %arg5: memref<128x128xf32, #tpu.memory_space<vmem>>, %arg6: memref<1x128xf32, #tpu.memory_space<vmem>>, %arg7: memref<8x128xf32, #tpu.memory_space<vmem>>) attributes {dimension_semantics = [#tpu.dimension_semantics<parallel>, #tpu.dimension_semantics<parallel>], iteration_bounds = array<i64: 1, 1>, scalar_prefetch = 0 : i64, scratch_operands = 0 : i64, tpu.core_type = #tpu.core_type<tc>, window_params = [{transform_indices = @transform_0, window_bounds = array<i64: 8, 128>}, {transform_indices = @transform_1, window_bounds = array<i64: 8, 128>}, {transform_indices = @transform_2, window_bounds = array<i64: 128, 128>}, {transform_indices = @transform_3, window_bounds = array<i64: 128, 128>}, {transform_indices = @transform_4, window_bounds = array<i64: 1, 128>}, {transform_indices = @transform_5, window_bounds = array<i64: 8, 128>}]} {
    %c0 = arith.constant 0 : index
    %c0_0 = arith.constant 0 : index
    %0 = vector.load %arg2[%c0, %c0_0] : memref<8x128xf32, #tpu.memory_space<vmem>>, vector<8x128xf32>
    %c0_1 = arith.constant 0 : index
    %c0_2 = arith.constant 0 : index
    %1 = vector.load %arg4[%c0_1, %c0_2] : memref<128x128xf32, #tpu.memory_space<vmem>>, vector<128x128xf32>
    %cst = arith.constant dense<0.000000e+00> : vector<8x128xf32>
    %2 = tpu.matmul %0, %1, %cst {dimension_numbers = #tpu.dot_dimension_numbers<[1], [1], [0], [0], [0, 0, 1, 0], [], []>} : vector<8x128xf32>, vector<128x128xf32>, vector<8x128xf32> -> vector<8x128xf32>
    %c0_3 = arith.constant 0 : index
    %c0_4 = arith.constant 0 : index
    %3 = vector.load %arg3[%c0_3, %c0_4] : memref<8x128xf32, #tpu.memory_space<vmem>>, vector<8x128xf32>
    %c0_5 = arith.constant 0 : index
    %c0_6 = arith.constant 0 : index
    %4 = vector.load %arg5[%c0_5, %c0_6] : memref<128x128xf32, #tpu.memory_space<vmem>>, vector<128x128xf32>
    %cst_7 = arith.constant dense<0.000000e+00> : vector<8x128xf32>
    %5 = tpu.matmul %3, %4, %cst_7 {dimension_numbers = #tpu.dot_dimension_numbers<[1], [1], [0], [0], [0, 0, 1, 0], [], []>} : vector<8x128xf32>, vector<128x128xf32>, vector<8x128xf32> -> vector<8x128xf32>
    %6 = arith.addf %2, %5 : vector<8x128xf32>
    %c0_8 = arith.constant 0 : index
    %c0_9 = arith.constant 0 : index
    %7 = vector.load %arg6[%c0_8, %c0_9] : memref<1x128xf32, #tpu.memory_space<vmem>>, vector<1x128xf32>
    %8 = vector.broadcast %7 : vector<1x128xf32> to vector<8x128xf32>
    %9 = arith.addf %6, %8 : vector<8x128xf32>
    %c0_10 = arith.constant 0 : index
    %c0_11 = arith.constant 0 : index
    %10 = vector.load %arg7[%c0_10, %c0_11] : memref<8x128xf32, #tpu.memory_space<vmem>>, vector<8x128xf32>
    tpu.vector_store %arg7[%c0_10, %c0_11], %9 {strides = array<i32>} : memref<8x128xf32, #tpu.memory_space<vmem>>, vector<8x128xf32>,
    return
  }
  func.func @transform_0(%arg0: i32, %arg1: i32) -> (i32, i32) {
    %c0_i32 = arith.constant 0 : i32
    %c0_i32_0 = arith.constant 0 : i32
    return %arg0, %c0_i32 : i32, i32
  }
  func.func @transform_1(%arg0: i32, %arg1: i32) -> (i32, i32) {
    %c0_i32 = arith.constant 0 : i32
    %c0_i32_0 = arith.constant 0 : i32
    return %arg0, %c0_i32 : i32, i32
  }
  func.func @transform_2(%arg0: i32, %arg1: i32) -> (i32, i32) {
    %c0_i32 = arith.constant 0 : i32
    %c0_i32_0 = arith.constant 0 : i32
    return %arg1, %c0_i32 : i32, i32
  }
  func.func @transform_3(%arg0: i32, %arg1: i32) -> (i32, i32) {
    %c0_i32 = arith.constant 0 : i32
    %c0_i32_0 = arith.constant 0 : i32
    return %arg1, %c0_i32 : i32, i32
  }
  func.func @transform_4(%arg0: i32, %arg1: i32) -> (i32, i32) {
    %c0_i32 = arith.constant 0 : i32
    %c0_i32_0 = arith.constant 0 : i32
    return %c0_i32, %arg1 : i32, i32
  }
  func.func @transform_5(%arg0: i32, %arg1: i32) -> (i32, i32) {
    %c0_i32 = arith.constant 0 : i32
    return %arg0, %arg1 : i32, i32
  }
}

</mosaic_0001>

<bundles_post_ra>
// kernel: tpu_custom_call.1
= control target key start
LH: loop header
LB: loop body
LE: loop exit
PB: predicated region body
PF: predicated region fallthrough
CT: control target
= control target key end

     0   :  { %10 = vsyncpa [#allocation3], 0  ;;  %s672_s0 = inlined_call_operand.hbm [shape: f32[8,128], index: 0, kind: input, shape index: {}]   ;;  %s673_s1 = inlined_call_operand.hbm [shape: f32[8,128], index: 1, kind: input, shape index: {}]   ;;  %s674_s2 = inlined_call_operand.hbm [shape: f32[128,128], index: 2, kind: input, shape index: {}]   ;;  %s675_s3 = inlined_call_operand.hbm [shape: f32[128,128], index: 3, kind: input, shape index: {}]   ;;  %s676_s4 = inlined_call_operand.vmem [shape: f32[1,128], index: 4, kind: input, shape index: {}]   ;;  %s677_s5 = inlined_call_operand.hbm [shape: f32[8,128], index: 5, kind: output, shape index: {}]  }
   0x1   :  { %11 = vsyncpa [#allocation6], 0 }
   0x2   :  { %12 = vsyncpa [#allocation9], 0 }
   0x3   :  { %13 = vsyncpa [#allocation4], 0  ;;  %s553_s18 = smov [#allocation5]   ;;  %s554_s20 = smov [#allocation2]  }
   0x4   :  { %s30_s19 = sshll.u32 %s553_s18, 4  ;;  %s20_s21 = sshll.u32 %s554_s20, 4  ;;  %s31_s19 = int_to_ptr.vmem [resolvable:$true] %s30_s19  ;;  %s21_s21 = int_to_ptr.vmem [resolvable:$true] %s20_s21 }
   0x5   :  { %s435_s24 = scalar_lea.hbm %s673_s1, 128 }
   0x6   :  { %p436_p0 = scmp.ne.s32.totalorder %s673_s1, %s435_s24  ;;  %p439_p1 = scmp.lt.u32.totalorder %s435_s24, %s673_s1 }
   0x8   :  { %p441_p2 = pnand %p439_p1, %p436_p0 }
   0xa   :  { %444 = shalt.err (!%p441_p2)
}
   0xb   :  { %s445_s29 = scalar_lea.vmem %s31_s19, 128  ;;  %p450_p4 = scmp.lt.s32.totalorder %s31_s19, %s31_s19 }
   0xc   :  { %p446_p3 = scmp.ne.s32.totalorder %s31_s19, %s445_s29  ;;  %p451_p5 = scmp.lt.s32.totalorder %s445_s29, %s445_s29 }
   0xe   :  { %p452_p6 = por %p451_p5, %p450_p4 }
  0x10   :  { %p453_p7 = pnand %p452_p6, %p446_p3 }
  0x12   :  { %456 = shalt.err (!%p453_p7)
}
  0x13   :  { %33 = dma.hbm_to_vmem [thread:$0]  %s673_s1, 128, %s31_s19, [#allocation6]  }
  0x14   :  { %s457_s9 = scalar_lea.hbm %s672_s0, 128 }
  0x15   :  { %p458_p8 = scmp.ne.s32.totalorder %s672_s0, %s457_s9  ;;  %p461_p9 = scmp.lt.u32.totalorder %s457_s9, %s672_s0 }
  0x17   :  { %p463_p10 = pnand %p461_p9, %p458_p8 }
  0x19   :  { %466 = shalt.err (!%p463_p10)
}
  0x1a   :  { %s467_s14 = scalar_lea.vmem %s21_s21, 128  ;;  %p472_p12 = scmp.lt.s32.totalorder %s21_s21, %s21_s21 }
  0x1b   :  { %p468_p11 = scmp.ne.s32.totalorder %s21_s21, %s467_s14  ;;  %p473_p13 = scmp.lt.s32.totalorder %s467_s14, %s467_s14 }
  0x1d   :  { %p474_p0 = por %p473_p13, %p472_p12 }
  0x1f   :  { %p475_p1 = pnand %p474_p0, %p468_p11 }
  0x21   :  { %478 = shalt.err (!%p475_p1)
}
  0x22   :  { %23 = dma.hbm_to_vmem [thread:$0]  %s672_s0, 128, %s21_s21, [#allocation3]  }
  0x23   :  { %s555_s16 = smov [#allocation7]   ;;  %s479_s20 = scalar_lea.hbm %s674_s2, 2048 }
  0x24   :  { %s39_s17 = sshll.u32 %s555_s16, 4  ;;  %p480_p2 = scmp.ne.s32.totalorder %s674_s2, %s479_s20  ;;  %s40_s17 = int_to_ptr.vmem [resolvable:$true] %s39_s17 }
  0x25   :  { %p483_p3 = scmp.lt.u32.totalorder %s479_s20, %s674_s2 }
  0x27   :  { %p485_p4 = pnand %p483_p3, %p480_p2 }
  0x29   :  { %488 = shalt.err (!%p485_p4)
}
  0x2a   :  { %s489_s26 = scalar_lea.vmem %s40_s17, 2048  ;;  %p494_p6 = scmp.lt.s32.totalorder %s40_s17, %s40_s17 }
  0x2b   :  { %p490_p5 = scmp.ne.s32.totalorder %s40_s17, %s489_s26  ;;  %p495_p7 = scmp.lt.s32.totalorder %s489_s26, %s489_s26 }
  0x2d   :  { %p496_p8 = por %p495_p7, %p494_p6 }
  0x2f   :  { %p497_p9 = pnand %p496_p8, %p490_p5 }
  0x31   :  { %500 = shalt.err (!%p497_p9)
}
  0x32   :  { %s556_s0 = smov 128   ;;  %s557_s21 = smov 8  }
  0x33   :  { %45 = dma.hbm_to_vmem [thread:$0]  %s674_s2, 2048, %s40_s17, [#allocation6], %s556_s0, %s556_s0, %s557_s21  }
  0x34   :  { %s558_s29 = smov [#allocation8]   ;;  %s501_s8 = scalar_lea.hbm %s675_s3, 2048 }
  0x35   :  { %s51_s30 = sshll.u32 %s558_s29, 4  ;;  %p502_p10 = scmp.ne.s32.totalorder %s675_s3, %s501_s8  ;;  %s52_s30 = int_to_ptr.vmem [resolvable:$true] %s51_s30 }
  0x36   :  { %p505_p11 = scmp.lt.u32.totalorder %s501_s8, %s675_s3 }
  0x38   :  { %p507_p12 = pnand %p505_p11, %p502_p10 }
  0x3a   :  { %510 = shalt.err (!%p507_p12)
}
  0x3b   :  { %s511_s13 = scalar_lea.vmem %s52_s30, 2048  ;;  %p516_p0 = scmp.lt.s32.totalorder %s52_s30, %s52_s30 }
  0x3c   :  { %p512_p13 = scmp.ne.s32.totalorder %s52_s30, %s511_s13  ;;  %p517_p1 = scmp.lt.s32.totalorder %s511_s13, %s511_s13 }
  0x3e   :  { %p518_p2 = por %p517_p1, %p516_p0 }
  0x40   :  { %p519_p3 = pnand %p518_p2, %p512_p13 }
  0x42   :  { %522 = shalt.err (!%p519_p3)
}
  0x43   :  { %57 = dma.hbm_to_vmem [thread:$0]  %s675_s3, 2048, %s52_s30, [#allocation9], %s556_s0, %s556_s0, %s557_s21  }
  0x44   :  { %545 = dma.done.wait [#allocation3], 128  }
  0x45   :  { %546 = vsyncadd [#allocation3], 4294967168 }
  0x46   :  { %547 = dma.done.wait [#allocation6], 2176  }
  0x47   :  { %548 = vsyncadd [#allocation6], 4294965120 }
  0x48   :  { %549 = dma.done.wait [#allocation9], 2048  }
  0x49   :  { %550 = vsyncadd [#allocation9], 4294965248  ;;  %v559_v0 = vmov 0.0|0.0   ;;  %vm560_vm0 = vmmov 0   ;;  %v561_v1 = vmov 0.0   ;;  %v90_v2 = vld [vmem:[#allocation8] sm:$0xff] }
  0x4a   :  { %377 = vmatprep.subr.bf16.mxu0 %v559_v0  ;;  %401 = vmatprep.subr.bf16.mxu1 %v559_v0  ;;  %v91_v3 = vld [vmem:[#allocation8 + $0x8] sm:$0xff]  ;;  %v73_v4 = vld [vmem:[#allocation7] sm:$0xff]  ;;  %v92_v8 = vld [vmem:[#allocation8 + $0x10] sm:$0xff]  ;;  %s562_s15 = smov [#allocation10]  }
  0x4b   :  { %339 = vmatprep.mubr.msk.f32.mxu0 %vm560_vm0, %v561_v1  ;;  %374 = vmatprep.mubr.msk.f32.mxu1 %vm560_vm0, %v561_v1  ;;  %v378_v5 = vpack.c.bf16 %v91_v3, %v90_v2  ;;  %v74_v6 = vld [vmem:[#allocation7 + $0x8] sm:$0xff]  ;;  %v93_v9 = vld [vmem:[#allocation8 + $0x18] sm:$0xff]  ;;  %v75_v10 = vld [vmem:[#allocation7 + $0x10] sm:$0xff]  ;;  %s261_s16 = sshll.u32 %s562_s15, 4  ;;  %s262_s16 = int_to_ptr.vmem [resolvable:$true] %s261_s16 }
  0x4c   :  { %v402_v7 = vpack.c.bf16 %v74_v6, %v73_v4  ;;  %v76_v11 = vld [vmem:[#allocation7 + $0x18] sm:$0xff]  ;;  %v381_v12 = vpack.c.bf16 %v93_v9, %v92_v8  ;;  %v94_v14 = vld [vmem:[#allocation8 + $0x20] sm:$0xff]  ;;  %v95_v15 = vld [vmem:[#allocation8 + $0x28] sm:$0xff]  ;;  %s523_s17 = scalar_lea.vmem %s262_s16, 128  ;;  %p528_p5 = scmp.lt.s32.totalorder %s262_s16, %s262_s16 }
  0x4d   :  { %379 = vmatpush3.bf16.xpose.msra.mxu0 %v378_v5  ;;  %v405_v13 = vpack.c.bf16 %v76_v11, %v75_v10  ;;  %v77_v16 = vld [vmem:[#allocation7 + $0x20] sm:$0xff]  ;;  %v78_v17 = vld [vmem:[#allocation7 + $0x28] sm:$0xff]  ;;  %v384_v18 = vpack.c.bf16 %v95_v15, %v94_v14  ;;  %v96_v20 = vld [vmem:[#allocation8 + $0x30] sm:$0xff]  ;;  %p524_p4 = scmp.ne.s32.totalorder %s262_s16, %s523_s17  ;;  %p529_p6 = scmp.lt.s32.totalorder %s523_s17, %s523_s17 }
  0x4e   :  { %403 = vmatpush3.bf16.xpose.msra.mxu1 %v402_v7  ;;  %380 = vmatprep.subr.bf16.mxu0 %v559_v0  ;;  %v408_v19 = vpack.c.bf16 %v78_v17, %v77_v16  ;;  %v97_v21 = vld [vmem:[#allocation8 + $0x38] sm:$0xff]  ;;  %v79_v22 = vld [vmem:[#allocation7 + $0x30] sm:$0xff]  ;;  %v98_v26 = vld [vmem:[#allocation8 + $0x40] sm:$0xff] }
  0x4f   :  { %404 = vmatprep.subr.bf16.mxu1 %v559_v0  ;;  %v80_v23 = vld [vmem:[#allocation7 + $0x38] sm:$0xff]  ;;  %v387_v24 = vpack.c.bf16 %v97_v21, %v96_v20  ;;  %v99_v27 = vld [vmem:[#allocation8 + $0x48] sm:$0xff]  ;;  %v81_v28 = vld [vmem:[#allocation7 + $0x40] sm:$0xff]  ;;  %p530_p7 = por %p529_p6, %p528_p5 }
  0x50   :  { %v411_v25 = vpack.c.bf16 %v80_v23, %v79_v22  ;;  %v82_v29 = vld [vmem:[#allocation7 + $0x48] sm:$0xff]  ;;  %v390_v30 = vpack.c.bf16 %v99_v27, %v98_v26  ;;  %v100_v32 = vld [vmem:[#allocation8 + $0x50] sm:$0xff]  ;;  %v101_v33 = vld [vmem:[#allocation8 + $0x58] sm:$0xff] }
  0x51   :  { %v414_v31 = vpack.c.bf16 %v82_v29, %v81_v28  ;;  %v83_v34 = vld [vmem:[#allocation7 + $0x50] sm:$0xff]  ;;  %v84_v35 = vld [vmem:[#allocation7 + $0x58] sm:$0xff]  ;;  %v393_v36 = vpack.c.bf16 %v101_v33, %v100_v32  ;;  %v102_v38 = vld [vmem:[#allocation8 + $0x60] sm:$0xff]  ;;  %p531_p8 = pnand %p530_p7, %p524_p4 }
  0x52   :  { %v417_v37 = vpack.c.bf16 %v84_v35, %v83_v34  ;;  %v103_v39 = vld [vmem:[#allocation8 + $0x68] sm:$0xff]  ;;  %v85_v40 = vld [vmem:[#allocation7 + $0x60] sm:$0xff]  ;;  %v104_v44 = vld [vmem:[#allocation8 + $0x70] sm:$0xff] }
  0x53   :  { %v86_v41 = vld [vmem:[#allocation7 + $0x68] sm:$0xff]  ;;  %v396_v42 = vpack.c.bf16 %v103_v39, %v102_v38  ;;  %v105_v45 = vld [vmem:[#allocation8 + $0x78] sm:$0xff]  ;;  %v87_v46 = vld [vmem:[#allocation7 + $0x70] sm:$0xff] }
  0x54   :  { %v420_v43 = vpack.c.bf16 %v86_v41, %v85_v40  ;;  %v88_v47 = vld [vmem:[#allocation7 + $0x78] sm:$0xff]  ;;  %v399_v48 = vpack.c.bf16 %v105_v45, %v104_v44  ;;  %v72_v51 = vld [vmem:[#allocation2] sm:$0xff] }
  0x55   :  { %382 = vmatpush3.bf16.xpose.msra.mxu0 %v381_v12  ;;  %v423_v49 = vpack.c.bf16 %v88_v47, %v87_v46  ;;  %v89_v50 = vld [vmem:[#allocation5] sm:$0xff]  ;;  %v272_v54 = vld [vmem:[%s676_s4] ss:$0 sm:$0xff] }
  0x56   :  { %406 = vmatpush3.bf16.xpose.msra.mxu1 %v405_v13  ;;  %383 = vmatprep.subr.bf16.mxu0 %v559_v0 }
  0x57   :  { %407 = vmatprep.subr.bf16.mxu1 %v559_v0 }
  0x5d   :  { %385 = vmatpush3.bf16.xpose.msra.mxu0 %v384_v18 }
  0x5e   :  { %409 = vmatpush3.bf16.xpose.msra.mxu1 %v408_v19  ;;  %386 = vmatprep.subr.bf16.mxu0 %v559_v0 }
  0x5f   :  { %410 = vmatprep.subr.bf16.mxu1 %v559_v0 }
  0x65   :  { %388 = vmatpush3.bf16.xpose.msra.mxu0 %v387_v24 }
  0x66   :  { %412 = vmatpush3.bf16.xpose.msra.mxu1 %v411_v25  ;;  %389 = vmatprep.subr.bf16.mxu0 %v559_v0 }
  0x67   :  { %413 = vmatprep.subr.bf16.mxu1 %v559_v0 }
  0x6d   :  { %391 = vmatpush3.bf16.xpose.msra.mxu0 %v390_v30 }
  0x6e   :  { %415 = vmatpush3.bf16.xpose.msra.mxu1 %v414_v31  ;;  %392 = vmatprep.subr.bf16.mxu0 %v559_v0 }
  0x6f   :  { %416 = vmatprep.subr.bf16.mxu1 %v559_v0 }
  0x75   :  { %394 = vmatpush3.bf16.xpose.msra.mxu0 %v393_v36 }
  0x76   :  { %418 = vmatpush3.bf16.xpose.msra.mxu1 %v417_v37  ;;  %395 = vmatprep.subr.bf16.mxu0 %v559_v0 }
  0x77   :  { %419 = vmatprep.subr.bf16.mxu1 %v559_v0 }
  0x7d   :  { %397 = vmatpush3.bf16.xpose.msra.mxu0 %v396_v42 }
  0x7e   :  { %421 = vmatpush3.bf16.xpose.msra.mxu1 %v420_v43  ;;  %398 = vmatprep.subr.bf16.mxu0 %v559_v0 }
  0x7f   :  { %422 = vmatprep.subr.bf16.mxu1 %v559_v0 }
  0x85   :  { %400 = vmatpush3.bf16.xpose.msra.mxu0 %v399_v48 }
  0x86   :  { %424 = vmatpush3.bf16.xpose.msra.mxu1 %v423_v49 }
  0x8c   :  { %340 = vmatmul.mubr.f32.vlgmr.msra.gmra.mrb[0].mxu0 %v89_v50 }
  0x8d   :  { %375 = vmatmul.mubr.f32.vlgmr.msra.gmra.mrb[0].mxu1 %v72_v51 }
 0x15f   :  { %v172_v52 = vpop.f32.mrb[0].mxu0 }
 0x160   :  { %v242_v53 = vpop.f32.mrb[0].mxu1  ;;  %v341_v55 = vpop.f32.mrb[1].mxu0 }
 0x161   :  { %v243_v56 = vadd.f32 %v242_v53, %v172_v52  ;;  %v376_v57 = vpop.f32.mrb[1].mxu1 }
 0x163   :  { %v253_v58 = vadd.f32 %v272_v54, %v243_v56 }
 0x165   :  { %254 = vst [vmem:[#allocation10] sm:$0xff] %v253_v58 }
 0x166   :  { %534 = shalt.err (!%p531_p8)
}
 0x167   :  { %s535_s20 = scalar_lea.hbm %s677_s5, 128 }
 0x168   :  { %p536_p9 = scmp.ne.s32.totalorder %s677_s5, %s535_s20  ;;  %p539_p10 = scmp.lt.u32.totalorder %s535_s20, %s677_s5 }
 0x16a   :  { %p541_p11 = pnand %p539_p10, %p536_p9 }
 0x16c   :  { %544 = shalt.err (!%p541_p11)
}
 0x16d   :  { %264 = dma.vmem_to_hbm [thread:$0]  %s262_s16, 128, %s677_s5, [#allocation4]  }
 0x16e   :  { %551 = dma.done.wait [#allocation4], 128  }
 0x16f   :  { %552 = vsyncadd [#allocation4], 4294967168 }
 0x170   :  { %268 = vsyncpa [#allocation3], 1 }
 0x171   :  { %269 = vsyncpa [#allocation6], 1 }
 0x172   :  { %270 = vsyncpa [#allocation9], 1 }
 0x173   :  { %271 = vsyncpa [#allocation4], 1 }

</bundles_post_ra>
